<compile_context>
chip_gen: v6e
topology: v6e:2x2x1
jax: 0.10.0
libtpu: 0.0.40
codegen_flags: <defaults>
</compile_context>

<pallas_src>
import jax
import jax.numpy as jnp
from jax import lax
from jax.experimental import pallas as pl
from jax.experimental.pallas import tpu as pltpu


def _round_up(x, m):
    return ((x + m - 1) // m) * m


def _cdiv(a, b):
    return -(-a // b)


def sine_embedding_kernel(t_ref, w0_ref, b0_ref, ws_ref, bs_ref, o_ref):
    # t_ref:  (TB, 1)  f32
    # w0_ref: (1, S)   f32        b0_ref: (1, S) f32
    # ws_ref: (D-1, S, S) f32|bf16   bs_ref: (D-1, 1, S) f32
    # o_ref:  (TB, S)  f32
    t = t_ref[...]                                          # (TB, 1)

    # Layer 0: Linear(1, S) -> sin.  Contraction dim is 1, so this is a
    # broadcasted multiply-add on the VPU (avoids a degenerate K=1 MXU matmul).
    h = jnp.sin(t * w0_ref[...] + b0_ref[...])              # (TB, S) f32

    # Layers 1..depth-1: Linear(S, S) -> sin on the MXU, fully unrolled.
    n_hidden = ws_ref.shape[0]
    w_dtype = ws_ref.dtype                                  # f32 or bf16

    def body(d, h):
        z = jnp.dot(h.astype(w_dtype), ws_ref[d],
                    preferred_element_type=jnp.float32) + bs_ref[d]
        return jnp.sin(z)

    h = lax.fori_loop(0, n_hidden, body, h, unroll=True)
    o_ref[...] = h


def prepare_params(w0, b0, hidden_ws, hidden_bs, *, use_bf16=False):
    """Do all casts/reshapes/stacking ONCE, off the per-call hot path.

    w0: (1, S); b0: (S,); hidden_ws: list of (S, S); hidden_bs: list of (S,).
    (Weights are (in_features, out_features) = PyTorch nn.Linear.weight.T.)
    use_bf16=True stores the (S, S) weight stack in bf16 for a bf16 MXU feed
    (f32 accumulation kept); expect ~1e-2 abs error vs. the f32 reference.
    """
    S = w0.shape[1]
    assert len(hidden_ws) >= 1, "depth must be >= 2"
    w_dtype = jnp.bfloat16 if use_bf16 else jnp.float32
    w_stack = jnp.stack(
        [jnp.asarray(w, jnp.float32).astype(w_dtype) for w in hidden_ws])       # (D-1, S, S)
    b_stack = jnp.stack(
        [jnp.asarray(b, jnp.float32).reshape(1, S) for b in hidden_bs])          # (D-1, 1, S)
    return (jnp.asarray(w0, jnp.float32),
            jnp.asarray(b0, jnp.float32).reshape(1, S),
            w_stack, b_stack)


def _choose_block_b(B, tile_b):
    """Pick (block_b, Bp, n_steps): block_b multiple of 8, >= 2 grid steps when
    B allows (v7x two-TensorCore sharding), minimal padding."""
    tile_b = max(8, _round_up(tile_b, 8))          # defensive: keep sublane rule
    Bp8 = _round_up(max(B, 1), 8)
    n_steps = max(_cdiv(Bp8, tile_b), 2 if Bp8 >= 16 else 1)
    block_b = _round_up(_cdiv(Bp8, n_steps), 8)    # <= tile_b by construction
    Bp = n_steps * block_b
    return block_b, Bp, n_steps


def _build_pallas_call(block_b, Bp, S, n_hidden, depth, n_steps, vmem_limit,
                       weight_bytes, single_buffer_weights):
    # Constant-index (grid-invariant) inputs: request single buffering so the
    # weight stack is not allocated twice in VMEM.
    resident = {"pipeline_mode": pl.Buffered(1)} if single_buffer_weights else {}
    return pl.pallas_call(
        sine_embedding_kernel,
        out_shape=jax.ShapeDtypeStruct((Bp, S), jnp.float32),
        grid_spec=pltpu.PrefetchScalarGridSpec(
            num_scalar_prefetch=0,
            grid=(n_steps,),
            in_specs=[
                pl.BlockSpec((block_b, 1), lambda i: (i, 0)),                    # time tile
                pl.BlockSpec((1, S), lambda i: (0, 0), **resident),              # w0 (resident)
                pl.BlockSpec((1, S), lambda i: (0, 0), **resident),              # b0 (resident)
                pl.BlockSpec((n_hidden, S, S), lambda i: (0, 0, 0), **resident),  # W stack
                pl.BlockSpec((n_hidden, 1, S), lambda i: (0, 0, 0), **resident),  # b stack
            ],
            out_specs=pl.BlockSpec((block_b, S), lambda i: (i, 0)),
        ),
        compiler_params=pltpu.CompilerParams(
            dimension_semantics=("parallel",),
            vmem_limit_bytes=vmem_limit,
        ),
        cost_estimate=pl.CostEstimate(
            flops=2 * Bp * S * S * n_hidden + 2 * Bp * S,
            transcendentals=Bp * S * depth,
            bytes_accessed=4 * Bp * (S + 1) + weight_bytes + 4 * 2 * S,
        ),
    )


def sine_embedding(time, params, *, tile_b=512):
    """time: (B,) f32; params from prepare_params -> (B, S) f32."""
    w0, b0, w_stack, b_stack = params
    B = time.shape[0]
    S = w0.shape[1]
    assert S % 128 == 0, (
        f"size must be a multiple of 128 for lane-dense tiles, got {S}")
    n_hidden = w_stack.shape[0]
    depth = n_hidden + 1

    block_b, Bp, n_steps = _choose_block_b(B, tile_b)

    t2d = jnp.asarray(time, jnp.float32).reshape(B, 1)
    if Bp != B:
        t2d = jnp.pad(t2d, ((0, Bp - B), (0, 0)))

    # Explicit scoped-VMEM budget: single-buffered weights + double-buffered
    # time/out tiles + f32 activation working set + headroom, clamped to
    # [32 MiB, 64 MiB] (>= all chips' defaults, <= v7x physical VMEM).
    w_itemsize = jnp.dtype(w_stack.dtype).itemsize
    weight_bytes = (w_itemsize * n_hidden * S * S
                    + 4 * (n_hidden * S + 2 * S))
    io_bytes = 4 * 2 * block_b * (S + 1)
    act_bytes = 4 * block_b * S * 4
    vmem_limit = int(1.4 * (weight_bytes + io_bytes + act_bytes)) + (4 << 20)
    vmem_limit = min(max(vmem_limit, 32 << 20), 64 << 20)

    args = (t2d, w0, b0, w_stack, b_stack)
    try:
        out = _build_pallas_call(block_b, Bp, S, n_hidden, depth, n_steps,
                                 vmem_limit, weight_bytes,
                                 single_buffer_weights=True)(*args)
    except Exception:
        # Fallback if this JAX build rejects pipeline_mode=pl.Buffered(1) on
        # pallas_call BlockSpecs: identical kernel with default buffering.
        out = _build_pallas_call(block_b, Bp, S, n_hidden, depth, n_steps,
                                 vmem_limit, weight_bytes,
                                 single_buffer_weights=False)(*args)

    return out[:B] if Bp != B else out


def reference(time, w0, b0, hidden_ws, hidden_bs):
    out = time[:, None]
    out = jnp.sin(out @ w0 + b0[None, :])
    for w, b in zip(hidden_ws, hidden_bs):
        out = jnp.sin(out @ w + b[None, :])
    return out


def _make_params(key, size, depth):
    """Deterministic init mimicking nn.Linear's U(-1/sqrt(fan_in), +...),
    stored as (in_features, out_features)."""
    keys = jax.random.split(key, 2 * depth)
    w0 = jax.random.uniform(keys[0], (1, size), jnp.float32, -1.0, 1.0)
    b0 = jax.random.uniform(keys[1], (size,), jnp.float32, -1.0, 1.0)
    bound = 1.0 / float(jnp.sqrt(size))
    hidden_ws, hidden_bs = [], []
    for d in range(depth - 1):
        hidden_ws.append(jax.random.uniform(keys[2 + 2 * d], (size, size),
                                            jnp.float32, -bound, bound))
        hidden_bs.append(jax.random.uniform(keys[3 + 2 * d], (size,),
                                            jnp.float32, -bound, bound))
    return w0, b0, hidden_ws, hidden_bs


if __name__ == "__main__":
    SIZE = 128
    key = jax.random.PRNGKey(0)
    k_t, k_p2, k_p3 = jax.random.split(key, 3)

    # Case A: depth=2 (module default), B=8 -> single grid step (too small to split).
    time_a = jax.random.uniform(k_t, (8,), jnp.float32, minval=0.0, maxval=10.0)
    w0, b0, hws, hbs = _make_params(k_p2, SIZE, depth=2)
    params2 = prepare_params(w0, b0, hws, hbs)
    out_a = jax.block_until_ready(sine_embedding(time_a, params2))
    ref_a = reference(time_a, w0, b0, hws, hbs)
    assert out_a.shape == (8, SIZE), out_a.shape
    assert jnp.allclose(out_a, ref_a, atol=1e-5, rtol=1e-5), \
        float(jnp.abs(out_a - ref_a).max())

    # Case B: depth=3, B=40, default tile -> exactly 2 parallel grid steps
    # (v7x two-core split) plus batch padding.
    time_b = jax.random.uniform(k_t, (40,), jnp.float32, minval=0.0, maxval=10.0)
    w0c, b0c, hwsc, hbsc = _make_params(k_p3, SIZE, depth=3)
    params3 = prepare_params(w0c, b0c, hwsc, hbsc)
    out_b = jax.block_until_ready(sine_embedding(time_b, params3))
    ref_b = reference(time_b, w0c, b0c, hwsc, hbsc)
    assert out_b.shape == (40, SIZE), out_b.shape
    assert jnp.allclose(out_b, ref_b, atol=1e-5, rtol=1e-5), \
        float(jnp.abs(out_b - ref_b).max())

    # Case C: same params, small tile -> >2 grid steps (multi-step pipeline,
    # resident weights reused across steps).
    out_c = jax.block_until_ready(sine_embedding(time_b, params3, tile_b=16))
    assert out_c.shape == (40, SIZE), out_c.shape
    assert jnp.allclose(out_c, ref_b, atol=1e-5, rtol=1e-5), \
        float(jnp.abs(out_c - ref_b).max())

    # Case D: bf16 MXU feed (optional fast path), same semantics, looser tolerance.
    params3_bf16 = prepare_params(w0c, b0c, hwsc, hbsc, use_bf16=True)
    out_d = jax.block_until_ready(sine_embedding(time_b, params3_bf16))
    assert out_d.shape == (40, SIZE), out_d.shape
    assert jnp.allclose(out_d, ref_b, atol=1e-1, rtol=1e-1), \
        float(jnp.abs(out_d - ref_b).max())

    print("KERNEL_OK")
</pallas_src>

<mosaic_0001>
module attributes {stable_mosaic.version = 11 : i64} {
  func.func @sine_embedding_kernel(%arg0: i32, %arg1: memref<8x1xf32, #tpu.memory_space<vmem>>, %arg2: memref<1x128xf32, #tpu.memory_space<vmem>>, %arg3: memref<1x128xf32, #tpu.memory_space<vmem>>, %arg4: memref<1x128x128xf32, #tpu.memory_space<vmem>>, %arg5: memref<1x1x128xf32, #tpu.memory_space<vmem>>, %arg6: memref<8x128xf32, #tpu.memory_space<vmem>>) attributes {dimension_semantics = [#tpu.dimension_semantics<parallel>], iteration_bounds = array<i64: 1>, scalar_prefetch = 0 : i64, scratch_operands = 0 : i64, tpu.core_type = #tpu.core_type<tc>, window_params = [{transform_indices = @transform_0, window_bounds = array<i64: 8, 1>}, {pipeline_mode = #tpu.pipeline_mode<synchronous>, transform_indices = @transform_1, window_bounds = array<i64: 1, 128>}, {pipeline_mode = #tpu.pipeline_mode<synchronous>, transform_indices = @transform_2, window_bounds = array<i64: 1, 128>}, {pipeline_mode = #tpu.pipeline_mode<synchronous>, transform_indices = @transform_3, window_bounds = array<i64: 1, 128, 128>}, {pipeline_mode = #tpu.pipeline_mode<synchronous>, transform_indices = @transform_4, window_bounds = array<i64: 1, 1, 128>}, {transform_indices = @transform_5, window_bounds = array<i64: 8, 128>}]} {
    %c0 = arith.constant 0 : index
    %c0_0 = arith.constant 0 : index
    %0 = vector.load %arg1[%c0, %c0_0] : memref<8x1xf32, #tpu.memory_space<vmem>>, vector<8x1xf32>
    %c0_1 = arith.constant 0 : index
    %c0_2 = arith.constant 0 : index
    %1 = vector.load %arg2[%c0_1, %c0_2] : memref<1x128xf32, #tpu.memory_space<vmem>>, vector<1x128xf32>
    %2 = vector.broadcast %0 : vector<8x1xf32> to vector<8x128xf32>
    %3 = vector.broadcast %1 : vector<1x128xf32> to vector<8x128xf32>
    %4 = arith.mulf %2, %3 : vector<8x128xf32>
    %c0_3 = arith.constant 0 : index
    %c0_4 = arith.constant 0 : index
    %5 = vector.load %arg3[%c0_3, %c0_4] : memref<1x128xf32, #tpu.memory_space<vmem>>, vector<1x128xf32>
    %6 = vector.broadcast %5 : vector<1x128xf32> to vector<8x128xf32>
    %7 = arith.addf %4, %6 : vector<8x128xf32>
    %8 = math.sin %7 : vector<8x128xf32>
    %c0_i32 = arith.constant 0 : i32
    %9 = arith.index_cast %c0_i32 : i32 to index
    %c0_5 = arith.constant 0 : index
    %c0_6 = arith.constant 0 : index
    %10 = vector.load %arg4[%9, %c0_5, %c0_6] : memref<1x128x128xf32, #tpu.memory_space<vmem>>, vector<1x128x128xf32>
    %11 = vector.shape_cast %10 : vector<1x128x128xf32> to vector<128x128xf32>
    %cst = arith.constant dense<0.000000e+00> : vector<8x128xf32>
    %12 = tpu.matmul %8, %11, %cst {dimension_numbers = #tpu.dot_dimension_numbers<[1], [0], [0], [1], [0, 0, 1, 1], [], []>} : vector<8x128xf32>, vector<128x128xf32>, vector<8x128xf32> -> vector<8x128xf32>
    %13 = arith.index_cast %c0_i32 : i32 to index
    %c0_7 = arith.constant 0 : index
    %c0_8 = arith.constant 0 : index
    %14 = vector.load %arg5[%13, %c0_7, %c0_8] : memref<1x1x128xf32, #tpu.memory_space<vmem>>, vector<1x1x128xf32>
    %15 = vector.shape_cast %14 : vector<1x1x128xf32> to vector<1x128xf32>
    %16 = vector.broadcast %15 : vector<1x128xf32> to vector<8x128xf32>
    %17 = arith.addf %12, %16 : vector<8x128xf32>
    %18 = math.sin %17 : vector<8x128xf32>
    %c1_i32 = arith.constant 1 : i32
    %c0_9 = arith.constant 0 : index
    %c0_10 = arith.constant 0 : index
    %19 = vector.load %arg6[%c0_9, %c0_10] : memref<8x128xf32, #tpu.memory_space<vmem>>, vector<8x128xf32>
    tpu.vector_store %arg6[%c0_9, %c0_10], %18 {strides = array<i32>} : memref<8x128xf32, #tpu.memory_space<vmem>>, vector<8x128xf32>,
    return
  }
  func.func @transform_0(%arg0: i32) -> (i32, i32) {
    %c0_i32 = arith.constant 0 : i32
    %c0_i32_0 = arith.constant 0 : i32
    return %arg0, %c0_i32 : i32, i32
  }
  func.func @transform_1(%arg0: i32) -> (i32, i32) {
    %c0_i32 = arith.constant 0 : i32
    %c0_i32_0 = arith.constant 0 : i32
    %c0_i32_1 = arith.constant 0 : i32
    return %c0_i32, %c0_i32_0 : i32, i32
  }
  func.func @transform_2(%arg0: i32) -> (i32, i32) {
    %c0_i32 = arith.constant 0 : i32
    %c0_i32_0 = arith.constant 0 : i32
    %c0_i32_1 = arith.constant 0 : i32
    return %c0_i32, %c0_i32_0 : i32, i32
  }
  func.func @transform_3(%arg0: i32) -> (i32, i32, i32) {
    %c0_i32 = arith.constant 0 : i32
    %c0_i32_0 = arith.constant 0 : i32
    %c0_i32_1 = arith.constant 0 : i32
    %c0_i32_2 = arith.constant 0 : i32
    return %c0_i32, %c0_i32_0, %c0_i32_1 : i32, i32, i32
  }
  func.func @transform_4(%arg0: i32) -> (i32, i32, i32) {
    %c0_i32 = arith.constant 0 : i32
    %c0_i32_0 = arith.constant 0 : i32
    %c0_i32_1 = arith.constant 0 : i32
    %c0_i32_2 = arith.constant 0 : i32
    return %c0_i32, %c0_i32_0, %c0_i32_1 : i32, i32, i32
  }
  func.func @transform_5(%arg0: i32) -> (i32, i32) {
    %c0_i32 = arith.constant 0 : i32
    %c0_i32_0 = arith.constant 0 : i32
    return %arg0, %c0_i32 : i32, i32
  }
}

module attributes {stable_mosaic.version = 11 : i64} {
  func.func @sine_embedding_kernel(%arg0: i32, %arg1: memref<8x1xf32, #tpu.memory_space<vmem>>, %arg2: memref<1x128xf32, #tpu.memory_space<vmem>>, %arg3: memref<1x128xf32, #tpu.memory_space<vmem>>, %arg4: memref<1x128x128xf32, #tpu.memory_space<vmem>>, %arg5: memref<1x1x128xf32, #tpu.memory_space<vmem>>, %arg6: memref<8x128xf32, #tpu.memory_space<vmem>>) attributes {dimension_semantics = [#tpu.dimension_semantics<parallel>], iteration_bounds = array<i64: 1>, scalar_prefetch = 0 : i64, scratch_operands = 0 : i64, tpu.core_type = #tpu.core_type<tc>, window_params = [{transform_indices = @transform_0, window_bounds = array<i64: 8, 1>}, {pipeline_mode = #tpu.pipeline_mode<synchronous>, transform_indices = @transform_1, window_bounds = array<i64: 1, 128>}, {pipeline_mode = #tpu.pipeline_mode<synchronous>, transform_indices = @transform_2, window_bounds = array<i64: 1, 128>}, {pipeline_mode = #tpu.pipeline_mode<synchronous>, transform_indices = @transform_3, window_bounds = array<i64: 1, 128, 128>}, {pipeline_mode = #tpu.pipeline_mode<synchronous>, transform_indices = @transform_4, window_bounds = array<i64: 1, 1, 128>}, {transform_indices = @transform_5, window_bounds = array<i64: 8, 128>}]} {
    %c0 = arith.constant 0 : index
    %c0_0 = arith.constant 0 : index
    %0 = vector.load %arg1[%c0, %c0_0] : memref<8x1xf32, #tpu.memory_space<vmem>>, vector<8x1xf32>
    %c0_1 = arith.constant 0 : index
    %c0_2 = arith.constant 0 : index
    %1 = vector.load %arg2[%c0_1, %c0_2] : memref<1x128xf32, #tpu.memory_space<vmem>>, vector<1x128xf32>
    %2 = vector.broadcast %0 : vector<8x1xf32> to vector<8x128xf32>
    %3 = vector.broadcast %1 : vector<1x128xf32> to vector<8x128xf32>
    %4 = arith.mulf %2, %3 : vector<8x128xf32>
    %c0_3 = arith.constant 0 : index
    %c0_4 = arith.constant 0 : index
    %5 = vector.load %arg3[%c0_3, %c0_4] : memref<1x128xf32, #tpu.memory_space<vmem>>, vector<1x128xf32>
    %6 = vector.broadcast %5 : vector<1x128xf32> to vector<8x128xf32>
    %7 = arith.addf %4, %6 : vector<8x128xf32>
    %8 = math.sin %7 : vector<8x128xf32>
    %c0_i32 = arith.constant 0 : i32
    %9 = arith.index_cast %c0_i32 : i32 to index
    %c0_5 = arith.constant 0 : index
    %c0_6 = arith.constant 0 : index
    %10 = vector.load %arg4[%9, %c0_5, %c0_6] : memref<1x128x128xf32, #tpu.memory_space<vmem>>, vector<1x128x128xf32>
    %11 = vector.shape_cast %10 : vector<1x128x128xf32> to vector<128x128xf32>
    %cst = arith.constant dense<0.000000e+00> : vector<8x128xf32>
    %12 = tpu.matmul %8, %11, %cst {dimension_numbers = #tpu.dot_dimension_numbers<[1], [0], [0], [1], [0, 0, 1, 1], [], []>} : vector<8x128xf32>, vector<128x128xf32>, vector<8x128xf32> -> vector<8x128xf32>
    %13 = arith.index_cast %c0_i32 : i32 to index
    %c0_7 = arith.constant 0 : index
    %c0_8 = arith.constant 0 : index
    %14 = vector.load %arg5[%13, %c0_7, %c0_8] : memref<1x1x128xf32, #tpu.memory_space<vmem>>, vector<1x1x128xf32>
    %15 = vector.shape_cast %14 : vector<1x1x128xf32> to vector<1x128xf32>
    %16 = vector.broadcast %15 : vector<1x128xf32> to vector<8x128xf32>
    %17 = arith.addf %12, %16 : vector<8x128xf32>
    %18 = math.sin %17 : vector<8x128xf32>
    %c1_i32 = arith.constant 1 : i32
    %c0_9 = arith.constant 0 : index
    %c0_10 = arith.constant 0 : index
    %19 = vector.load %arg6[%c0_9, %c0_10] : memref<8x128xf32, #tpu.memory_space<vmem>>, vector<8x128xf32>
    tpu.vector_store %arg6[%c0_9, %c0_10], %18 {strides = array<i32>} : memref<8x128xf32, #tpu.memory_space<vmem>>, vector<8x128xf32>,
    return
  }
  func.func @transform_0(%arg0: i32) -> (i32, i32) {
    %c0_i32 = arith.constant 0 : i32
    %c0_i32_0 = arith.constant 0 : i32
    return %arg0, %c0_i32 : i32, i32
  }
  func.func @transform_1(%arg0: i32) -> (i32, i32) {
    %c0_i32 = arith.constant 0 : i32
    %c0_i32_0 = arith.constant 0 : i32
    %c0_i32_1 = arith.constant 0 : i32
    return %c0_i32, %c0_i32_0 : i32, i32
  }
  func.func @transform_2(%arg0: i32) -> (i32, i32) {
    %c0_i32 = arith.constant 0 : i32
    %c0_i32_0 = arith.constant 0 : i32
    %c0_i32_1 = arith.constant 0 : i32
    return %c0_i32, %c0_i32_0 : i32, i32
  }
  func.func @transform_3(%arg0: i32) -> (i32, i32, i32) {
    %c0_i32 = arith.constant 0 : i32
    %c0_i32_0 = arith.constant 0 : i32
    %c0_i32_1 = arith.constant 0 : i32
    %c0_i32_2 = arith.constant 0 : i32
    return %c0_i32, %c0_i32_0, %c0_i32_1 : i32, i32, i32
  }
  func.func @transform_4(%arg0: i32) -> (i32, i32, i32) {
    %c0_i32 = arith.constant 0 : i32
    %c0_i32_0 = arith.constant 0 : i32
    %c0_i32_1 = arith.constant 0 : i32
    %c0_i32_2 = arith.constant 0 : i32
    return %c0_i32, %c0_i32_0, %c0_i32_1 : i32, i32, i32
  }
  func.func @transform_5(%arg0: i32) -> (i32, i32) {
    %c0_i32 = arith.constant 0 : i32
    %c0_i32_0 = arith.constant 0 : i32
    return %arg0, %c0_i32 : i32, i32
  }
}

</mosaic_0001>

<bundles_post_ra>
// kernel: tpu_custom_call.1
= control target key start
LH: loop header
LB: loop body
LE: loop exit
PB: predicated region body
PF: predicated region fallthrough
CT: control target
= control target key end

     0   :  { %10 = vsyncpa [#allocation3], 0  ;;  %s636_s0 = inlined_call_operand.vmem [shape: f32[8,1], index: 0, kind: input, shape index: {}]   ;;  %s637_s1 = inlined_call_operand.vmem [shape: f32[1,128], index: 1, kind: input, shape index: {}]   ;;  %s638_s2 = inlined_call_operand.vmem [shape: f32[1,128], index: 2, kind: input, shape index: {}]   ;;  %s639_s3 = inlined_call_operand.hbm [shape: f32[1,128,128], index: 3, kind: input, shape index: {}]   ;;  %s640_s4 = inlined_call_operand.vmem [shape: f32[1,1,128], index: 4, kind: input, shape index: {}]   ;;  %s641_s5 = inlined_call_operand.hbm [shape: f32[8,128], index: 5, kind: output, shape index: {}]  }
   0x1   :  { %11 = vsyncpa [#allocation4], 0  ;;  %s511_s18 = smov [#allocation2]  }
   0x2   :  { %s23_s19 = sshll.u32 %s511_s18, 4  ;;  %s24_s19 = int_to_ptr.vmem [resolvable:$true] %s23_s19 }
   0x3   :  { %s475_s20 = scalar_lea.vmem %s24_s19, 2048  ;;  %p480_p1 = scmp.lt.s32.totalorder %s24_s19, %s24_s19 }
   0x4   :  { %p476_p0 = scmp.ne.s32.totalorder %s24_s19, %s475_s20  ;;  %p481_p2 = scmp.lt.s32.totalorder %s475_s20, %s475_s20 }
   0x6   :  { %p482_p3 = por %p481_p2, %p480_p1 }
   0x8   :  { %p483_p4 = pnand %p482_p3, %p476_p0 }
   0xa   :  { %486 = shalt.err (!%p483_p4)
}
   0xb   :  { %s512_s21 = smov 128   ;;  %s513_s22 = smov 8  }
   0xc   :  { %29 = dma.hbm_to_vmem [thread:$0]  %s639_s3, 2048, %s24_s19, [#allocation3], %s512_s21, %s512_s21, %s513_s22  }
   0xd   :  { %507 = dma.done.wait [#allocation3], 2048  }
   0xe   :  { %508 = vsyncadd [#allocation3], 4294965248  ;;  %v514_v0 = vmov 0   ;;  %v35_v1 = vld [vmem:[%s636_s0] sm:$0xff]  ;;  %v176_v2 = vld [vmem:[#allocation2 + $0x78] sm:$0xff]  ;;  %v515_v3 = vmov 0.0  }
   0xf   :  { %458 = vset.pattern.permute.xlu0 %v514_v0  ;;  %402 = vmatprep.subr.mxu0 %v515_v3  ;;  %v175_v4 = vld [vmem:[#allocation2 + $0x70] sm:$0xff]  ;;  %vm516_vm0 = vmmov 0   ;;  %v174_v5 = vld [vmem:[#allocation2 + $0x68] sm:$0xff]  ;;  %v173_v6 = vld [vmem:[#allocation2 + $0x60] sm:$0xff]  ;;  %v517_v35 = vmov 2102212464  }
  0x10   :  { %39 = vperm.xlu0 %458, %v35_v1   ;;  %434 = vmatprep.mubr.msk.f32.mxu0 %vm516_vm0, %v515_v3  ;;  %v172_v7 = vld [vmem:[#allocation2 + $0x58] sm:$0xff]  ;;  %v171_v8 = vld [vmem:[#allocation2 + $0x50] sm:$0xff]  ;;  %v170_v9 = vld [vmem:[#allocation2 + $0x48] sm:$0xff]  ;;  %v518_v37 = vmov 920167782  }
  0x11   :  { %403 = vmatpush3.msra.mxu0 %v176_v2  ;;  %v169_v10 = vld [vmem:[#allocation2 + $0x40] sm:$0xff]  ;;  %v168_v11 = vld [vmem:[#allocation2 + $0x38] sm:$0xff]  ;;  %v167_v12 = vld [vmem:[#allocation2 + $0x30] sm:$0xff]  ;;  %v519_v41 = vmov 1326507024  }
  0x12   :  { %404 = vmatprep.subr.mxu0 %v515_v3  ;;  %v166_v13 = vld [vmem:[#allocation2 + $0x28] sm:$0xff]  ;;  %v165_v14 = vld [vmem:[#allocation2 + $0x20] sm:$0xff]  ;;  %v164_v15 = vld [vmem:[#allocation2 + $0x18] sm:$0xff]  ;;  %v520_v43 = vmov 683565275  }
  0x13   :  { %405 = vmatpush3.msra.mxu0 %v175_v4  ;;  %v163_v16 = vld [vmem:[#allocation2 + $0x10] sm:$0xff]  ;;  %v162_v17 = vld [vmem:[#allocation2 + $0x8] sm:$0xff]  ;;  %v161_v18 = vld [vmem:[#allocation2] sm:$0xff]  ;;  %v521_v45 = vmov 2475754826  }
  0x14   :  { %406 = vmatprep.subr.mxu0 %v515_v3  ;;  %v374_v19 = vld [vmem:[%s637_s1] ss:$0 sm:$0xff]  ;;  %v522_v48 = vmov 2131351028  }
  0x15   :  { %407 = vmatpush3.msra.mxu0 %v174_v5  ;;  %v375_v20 = vld [vmem:[%s638_s2] ss:$0 sm:$0xff] }
  0x16   :  { %408 = vmatprep.subr.mxu0 %v515_v3 }
  0x17   :  { %409 = vmatpush3.msra.mxu0 %v173_v6 }
  0x18   :  { %410 = vmatprep.subr.mxu0 %v515_v3 }
  0x19   :  { %411 = vmatpush3.msra.mxu0 %v172_v7 }
  0x1a   :  { %412 = vmatprep.subr.mxu0 %v515_v3 }
  0x1b   :  { %413 = vmatpush3.msra.mxu0 %v171_v8 }
  0x1c   :  { %414 = vmatprep.subr.mxu0 %v515_v3 }
  0x1d   :  { %415 = vmatpush3.msra.mxu0 %v170_v9 }
  0x1e   :  { %416 = vmatprep.subr.mxu0 %v515_v3 }
  0x1f   :  { %417 = vmatpush3.msra.mxu0 %v169_v10 }
  0x20   :  { %418 = vmatprep.subr.mxu0 %v515_v3 }
  0x21   :  { %419 = vmatpush3.msra.mxu0 %v168_v11 }
  0x22   :  { %420 = vmatprep.subr.mxu0 %v515_v3 }
  0x23   :  { %421 = vmatpush3.msra.mxu0 %v167_v12 }
  0x24   :  { %422 = vmatprep.subr.mxu0 %v515_v3 }
  0x25   :  { %423 = vmatpush3.msra.mxu0 %v166_v13 }
  0x26   :  { %424 = vmatprep.subr.mxu0 %v515_v3 }
  0x27   :  { %425 = vmatpush3.msra.mxu0 %v165_v14 }
  0x28   :  { %426 = vmatprep.subr.mxu0 %v515_v3 }
  0x29   :  { %427 = vmatpush3.msra.mxu0 %v164_v15 }
  0x2a   :  { %428 = vmatprep.subr.mxu0 %v515_v3 }
  0x2b   :  { %429 = vmatpush3.msra.mxu0 %v163_v16 }
  0x2c   :  { %430 = vmatprep.subr.mxu0 %v515_v3 }
  0x2d   :  { %431 = vmatpush3.msra.mxu0 %v162_v17 }
  0x2e   :  { %432 = vmatprep.subr.mxu0 %v515_v3 }
  0x2f   :  { %433 = vmatpush3.msra.mxu0 %v161_v18 }
  0x8b   :  { %v40_v21 = vpop.permute.xlu0 %39 }
  0x8c   :  { %v48_v22 = vmul.f32 %v374_v19, %v40_v21 }
  0x8e   :  { %v566_v23 = vadd.f32 %v375_v20, %v48_v22 }
  0x90   :  { %v60_v24 = vand.u32 2139095040, %v566_v23  ;;  %v57_v25 = vand.u32 2147483647, %v566_v23  ;;  %vm59_vm8 = vcmp.lt.s32.totalorder %v566_v23, 0  ;;  %vm149_vm13 = vweird.f32 %v566_v23 }
  0x92   :  { %v61_v26 = vshrl.u32 %v60_v24, 23  ;;  %v64_v28 = vand.u32 8388607, %v57_v25  ;;  %vm58_vm9 = vcmp.le.f32.partialorder %v57_v25, 0.7853982 }
  0x94   :  { %v376_v27 = vadd.s32 4294967169, %v61_v26  ;;  %v65_v31 = vor.u32 8388608, %v64_v28 }
  0x96   :  { %v67_v29 = vadd.s32 1, %v376_v27  ;;  %v105_v39 = vshll.u32 %v65_v31, 8 }
  0x98   :  { %vm68_vm1 = vcmp.gt.s32.totalorder %v67_v29, 0 }
  0x99   :  { %v69_v30 = vsel %vm68_vm1, %v67_v29, 0 }
  0x9a   :  { %v71_v32 = vand.u32 31, %v69_v30  ;;  %v70_v33 = vshrl.u32 %v69_v30, 5 }
  0x9c   :  { %v72_v34 = vsub.s32 32, %v71_v32  ;;  %v83_v36 = vshll.u32 %v517_v35, %v71_v32  ;;  %v86_v38 = vshll.u32 %v518_v37, %v71_v32  ;;  %v74_v44 = vshll.u32 %v520_v43, %v71_v32 }
  0x9d   :  { %v77_v47 = vshll.u32 %v521_v45, %v71_v32  ;;  %v80_v50 = vshll.u32 %v522_v48, %v71_v32  ;;  %vm92_vm2 = vcmp.lt.s32.totalorder %v70_v33, 4  ;;  %vm89_vm3 = vcmp.lt.s32.totalorder %v70_v33, 1 }
  0x9e   :  { %v84_v40 = vshrl.u32 %v518_v37, %v72_v34  ;;  %v87_v42 = vshrl.u32 %v519_v41, %v72_v34  ;;  %v75_v46 = vshrl.u32 %v521_v45, %v72_v34  ;;  %v78_v49 = vshrl.u32 %v522_v48, %v72_v34 }
  0x9f   :  { %v81_v51 = vshrl.u32 %v517_v35, %v72_v34  ;;  %v73_v55 = vshrl.u32 %v520_v43, %v72_v34  ;;  %vm90_vm4 = vcmp.lt.s32.totalorder %v70_v33, 2  ;;  %vm91_vm5 = vcmp.lt.s32.totalorder %v70_v33, 3 }
  0xa0   :  { %v85_v52 = vor.u32 %v84_v40, %v83_v36  ;;  %v88_v53 = vor.u32 %v87_v42, %v86_v38  ;;  %v76_v54 = vor.u32 %v75_v46, %v74_v44  ;;  %v79_v56 = vor.u32 %v78_v49, %v77_v47 }
  0xa1   :  { %v82_v57 = vor.u32 %v81_v51, %v80_v50 }
  0xa2   :  { %v98_v58 = vsel %vm92_vm2, %v85_v52, 920167782  ;;  %v102_v59 = vsel %vm92_vm2, %v88_v53, 1326507024  ;;  %v97_v61 = vsel %vm89_vm3, %v76_v54, %v79_v56  ;;  %v93_v0 = vsel %vm89_vm3, %v73_v55, %v76_v54 }
  0xa3   :  { %v94_v60 = vsel %vm92_vm2, %v82_v57, 2102212464  ;;  %v99_v62 = vsel %vm91_vm5, %v82_v57, %v98_v58  ;;  %v101_v63 = vsel %vm89_vm3, %v79_v56, %v82_v57  ;;  %v103_v3 = vsel %vm91_vm5, %v85_v52, %v102_v59  ;;  %v380_v58 = vld [vmem:[%s640_s4] ss:$0 sm:$0xff]  ;;  %s523_s4 = smov [#allocation5]  }
  0xa4   :  { %v95_v1 = vsel %vm91_vm5, %v79_v56, %v94_v60  ;;  %v100_v2 = vsel %vm90_vm4, %v97_v61, %v99_v62  ;;  %v104_v4 = vsel %vm90_vm4, %v101_v63, %v103_v3  ;;  %s365_s29 = sshll.u32 %s523_s4, 4  ;;  %s366_s29 = int_to_ptr.vmem [resolvable:$true] %s365_s29 }
  0xa5   :  { %v583_v5 = vmul.u32.u64.low %v105_v39, %v100_v2  ;;  %v584_v6 = vmul.u32.u64.high %v105_v39, %v100_v2, %v583_v5  ;;  %v586_v7 = vmul.u32.u64.low %v105_v39, %v104_v4  ;;  %v587_v8 = vmul.u32.u64.high %v105_v39, %v104_v4, %v586_v7  ;;  %s487_s30 = scalar_lea.vmem %s366_s29, 128  ;;  %p492_p6 = scmp.lt.s32.totalorder %s366_s29, %s366_s29 }
  0xa6   :  { %v96_v9 = vsel %vm90_vm4, %v93_v0, %v95_v1  ;;  %p488_p5 = scmp.ne.s32.totalorder %s366_s29, %s487_s30  ;;  %p493_p7 = scmp.lt.s32.totalorder %s487_s30, %s487_s30 }
  0xa7   :  { %v115_v10 = vadd.s32 1, %v584_v6  ;;  %v112_v11 = vmul.u32 %v105_v39, %v96_v9  ;;  %vm114_vm6 = vc.u32 %v587_v8, %v583_v5  ;;  %v113_v24 = vadd.s32 %v583_v5, %v587_v8 }
  0xa8   :  { %p494_p8 = por %p493_p7, %p492_p6 }
  0xa9   :  { %v116_v12 = vsel %vm114_vm6, %v115_v10, %v584_v6 }
  0xaa   :  { %v117_v13 = vadd.s32 %v116_v12, %v112_v11  ;;  %p495_p9 = pnand %p494_p8, %p488_p5 }
  0xac   :  { %v118_v14 = vadd.s32 536870912, %v117_v13 }
  0xae   :  { %v119_v15 = vshrl.u32 %v118_v14, 30 }
  0xb0   :  { %v120_v16 = vshll.u32 %v119_v15, 30  ;;  %v143_v40 = vsub.s32 4, %v119_v15 }
  0xb2   :  { %v121_v17 = vsub.s32 %v117_v13, %v120_v16  ;;  %v144_v46 = vsel %vm59_vm8, %v143_v40, %v119_v15 }
  0xb3   :  { %v146_v47 = vsel %vm58_vm9, 0, %v144_v46 }
  0xb4   :  { %v123_v18 = vsub.s32 0, %v121_v17  ;;  %v150_v49 = vadd.s32 3, %v146_v47 }
  0xb6   :  { %v377_v19 = vmin.u32 %v123_v18, %v121_v17  ;;  %v151_v50 = vand.u32 3, %v150_v49 }
  0xb8   :  { %v125_v20 = vclz %v377_v19  ;;  %vm156_vm10 = vcmp.eq.s32.totalorder %v151_v50, 2  ;;  %vm153_vm11 = vcmp.eq.s32.totalorder %v151_v50, 0  ;;  %vm152_vm12 = vcmp.lt.s32.totalorder %v151_v50, 2 }
  0xba   :  { %v378_v21 = vadd.s32 4294967294, %v125_v20 }
  0xbc   :  { %vm379_vm7 = vcmp.lt.s32.totalorder %v378_v21, 0 }
  0xbd   :  { %v128_v22 = vsel %vm379_vm7, 0, %v378_v21 }
  0xbe   :  { %v129_v26 = vsub.s32 32, %v128_v22  ;;  %v133_v27 = vsub.s32 4294967266, %v128_v22  ;;  %v130_v28 = vshll.u32 %v121_v17, %v128_v22 }
  0xc0   :  { %v131_v29 = vshrl.u32 %v113_v24, %v129_v26  ;;  %v134_v30 = vadd.s32 127, %v133_v27 }
  0xc2   :  { %v132_v31 = vor.u32 %v131_v29, %v130_v28  ;;  %v135_v32 = vshll.u32 %v134_v30, 23 }
  0xc4   :  { %v136_v33 = vor.u32 4788187, %v135_v32  ;;  %v139_v36 = vcvt.s32.f32 %v132_v31 }
  0xc6   :  { %v137_v34 = vand.u32 2147483647, %v136_v33 }
  0xc8   :  { %v140_v38 = vmul.f32 %v139_v36, %v137_v34 }
  0xca   :  { %v141_v39 = vxor.u32 2147483648, %v140_v38 }
  0xcc   :  { %v142_v42 = vsel %vm59_vm8, %v141_v39, %v140_v38 }
  0xcd   :  { %v145_v44 = vsel %vm58_vm9, %v566_v23, %v142_v42 }
  0xce   :  { %459 = vcosq.f32 %v145_v44 }
  0xcf   :  { %461 = vsinq.f32 %v145_v44 }
  0xdb   :  { %v460_v51 = vpop.eup %459 }
  0xdc   :  { %v462_v52 = vpop.eup %461  ;;  %v157_v53 = vxor.u32 2147483648, %v460_v51 }
  0xdd   :  { %v154_v54 = vxor.u32 2147483648, %v462_v52 }
  0xde   :  { %v158_v55 = vsel %vm156_vm10, %v157_v53, %v462_v52 }
  0xdf   :  { %v155_v56 = vsel %vm153_vm11, %v460_v51, %v154_v54 }
  0xe0   :  { %v159_v25 = vsel %vm152_vm12, %v155_v56, %v158_v55 }
  0xe1   :  { %v160_v57 = vsel %vm149_vm13, nan, %v159_v25 }
  0xe2   :  { %435 = vmatmul.mubr.f32.vlgmr.msra.gmra.mxu0 %v160_v57 }
 0x1a2   :  { %v250_v59 = vpop.f32.mrf.mxu0 }
 0x1a3   :  { %v601_v60 = vadd.f32 %v380_v58, %v250_v59 }
 0x1a4   :  { %v436_v61 = vpop.f32.mrf.mxu0 }
 0x1a5   :  { %v257_v62 = vand.u32 2139095040, %v601_v60  ;;  %v254_v2 = vand.u32 2147483647, %v601_v60  ;;  %vm256_vm5 = vcmp.lt.s32.totalorder %v601_v60, 0  ;;  %vm346_vm10 = vweird.f32 %v601_v60 }
 0x1a7   :  { %v258_v63 = vshrl.u32 %v257_v62, 23  ;;  %v261_v4 = vand.u32 8388607, %v254_v2  ;;  %vm255_vm6 = vcmp.le.f32.partialorder %v254_v2, 0.7853982 }
 0x1a9   :  { %v381_v0 = vadd.s32 4294967169, %v258_v63  ;;  %v262_v17 = vor.u32 8388608, %v261_v4 }
 0x1ab   :  { %v264_v1 = vadd.s32 1, %v381_v0 }
 0x1ad   :  { %vm265_vm14 = vcmp.gt.s32.totalorder %v264_v1, 0 }
 0x1ae   :  { %v266_v23 = vsel %vm265_vm14, %v264_v1, 0 }
 0x1af   :  { %v268_v3 = vand.u32 31, %v266_v23  ;;  %v267_v6 = vshrl.u32 %v266_v23, 5 }
 0x1b1   :  { %v269_v5 = vsub.s32 32, %v268_v3  ;;  %v271_v7 = vshll.u32 %v520_v43, %v268_v3  ;;  %v274_v8 = vshll.u32 %v521_v45, %v268_v3  ;;  %v277_v11 = vshll.u32 %v522_v48, %v268_v3 }
 0x1b2   :  { %v280_v13 = vshll.u32 %v517_v35, %v268_v3  ;;  %v283_v15 = vshll.u32 %v518_v37, %v268_v3  ;;  %vm286_vm15 = vcmp.lt.s32.totalorder %v267_v6, 1  ;;  %vm289_vm0 = vcmp.lt.s32.totalorder %v267_v6, 4 }
 0x1b3   :  { %v272_v9 = vshrl.u32 %v521_v45, %v269_v5  ;;  %v275_v10 = vshrl.u32 %v522_v48, %v269_v5  ;;  %v278_v12 = vshrl.u32 %v517_v35, %v269_v5  ;;  %v281_v14 = vshrl.u32 %v518_v37, %v269_v5 }
 0x1b4   :  { %v284_v16 = vshrl.u32 %v519_v41, %v269_v5  ;;  %v270_v26 = vshrl.u32 %v520_v43, %v269_v5  ;;  %vm288_vm1 = vcmp.lt.s32.totalorder %v267_v6, 3  ;;  %vm287_vm2 = vcmp.lt.s32.totalorder %v267_v6, 2 }
 0x1b5   :  { %v273_v18 = vor.u32 %v272_v9, %v271_v7  ;;  %v276_v19 = vor.u32 %v275_v10, %v274_v8  ;;  %v279_v20 = vor.u32 %v278_v12, %v277_v11  ;;  %v282_v21 = vor.u32 %v281_v14, %v280_v13 }
 0x1b6   :  { %v285_v45 = vor.u32 %v284_v16, %v283_v15  ;;  %v302_v41 = vshll.u32 %v262_v17, 8 }
 0x1b7   :  { %v291_v22 = vsel %vm289_vm0, %v279_v20, 2102212464  ;;  %v294_v48 = vsel %vm286_vm15, %v273_v18, %v276_v19  ;;  %v298_v24 = vsel %vm286_vm15, %v276_v19, %v279_v20  ;;  %v295_v35 = vsel %vm289_vm0, %v282_v21, 920167782 }
 0x1b8   :  { %v299_v27 = vsel %vm289_vm0, %v285_v45, 1326507024  ;;  %v296_v37 = vsel %vm288_vm1, %v279_v20, %v295_v35  ;;  %v290_v29 = vsel %vm286_vm15, %v270_v26, %v273_v18  ;;  %v292_v30 = vsel %vm288_vm1, %v276_v19, %v291_v22 }
 0x1b9   :  { %v300_v28 = vsel %vm288_vm1, %v282_v21, %v299_v27  ;;  %v297_v31 = vsel %vm287_vm2, %v294_v48, %v296_v37  ;;  %v293_v39 = vsel %vm287_vm2, %v290_v29, %v292_v30 }
 0x1ba   :  { %v301_v32 = vsel %vm287_vm2, %v298_v24, %v300_v28  ;;  %v621_v36 = vmul.u32.u64.low %v302_v41, %v297_v31  ;;  %v622_v38 = vmul.u32.u64.high %v302_v41, %v297_v31, %v621_v36  ;;  %v309_v40 = vmul.u32 %v302_v41, %v293_v39 }
 0x1bb   :  { %v618_v33 = vmul.u32.u64.low %v302_v41, %v301_v32  ;;  %v619_v34 = vmul.u32.u64.high %v302_v41, %v301_v32, %v618_v33 }
 0x1bc   :  { %v312_v43 = vadd.s32 1, %v622_v38 }
 0x1bd   :  { %vm311_vm3 = vc.u32 %v619_v34, %v621_v36  ;;  %v310_v56 = vadd.s32 %v621_v36, %v619_v34 }
 0x1be   :  { %v313_v42 = vsel %vm311_vm3, %v312_v43, %v622_v38 }
 0x1bf   :  { %v314_v44 = vadd.s32 %v313_v42, %v309_v40 }
 0x1c1   :  { %v315_v46 = vadd.s32 536870912, %v314_v44 }
 0x1c3   :  { %v316_v47 = vshrl.u32 %v315_v46, 30 }
 0x1c5   :  { %v317_v49 = vshll.u32 %v316_v47, 30  ;;  %v340_v5 = vsub.s32 4, %v316_v47 }
 0x1c7   :  { %v318_v50 = vsub.s32 %v314_v44, %v317_v49  ;;  %v341_v8 = vsel %vm256_vm5, %v340_v5, %v316_v47 }
 0x1c8   :  { %v343_v9 = vsel %vm255_vm6, 0, %v341_v8 }
 0x1c9   :  { %v320_v51 = vsub.s32 0, %v318_v50  ;;  %v347_v10 = vadd.s32 3, %v343_v9 }
 0x1cb   :  { %v382_v52 = vmin.u32 %v320_v51, %v318_v50  ;;  %v348_v11 = vand.u32 3, %v347_v10 }
 0x1cd   :  { %v322_v53 = vclz %v382_v52  ;;  %vm353_vm7 = vcmp.eq.s32.totalorder %v348_v11, 2  ;;  %vm350_vm8 = vcmp.eq.s32.totalorder %v348_v11, 0  ;;  %vm349_vm9 = vcmp.lt.s32.totalorder %v348_v11, 2 }
 0x1cf   :  { %v383_v54 = vadd.s32 4294967294, %v322_v53 }
 0x1d1   :  { %vm384_vm4 = vcmp.lt.s32.totalorder %v383_v54, 0 }
 0x1d2   :  { %v325_v55 = vsel %vm384_vm4, 0, %v383_v54 }
 0x1d3   :  { %v326_v25 = vsub.s32 32, %v325_v55  ;;  %v330_v57 = vsub.s32 4294967266, %v325_v55  ;;  %v327_v58 = vshll.u32 %v318_v50, %v325_v55 }
 0x1d5   :  { %v328_v59 = vshrl.u32 %v310_v56, %v326_v25  ;;  %v331_v61 = vadd.s32 127, %v330_v57 }
 0x1d7   :  { %v329_v62 = vor.u32 %v328_v59, %v327_v58  ;;  %v332_v63 = vshll.u32 %v331_v61, 23 }
 0x1d9   :  { %v333_v0 = vor.u32 4788187, %v332_v63  ;;  %v336_v23 = vcvt.s32.f32 %v329_v62 }
 0x1db   :  { %v334_v1 = vand.u32 2147483647, %v333_v0 }
 0x1dd   :  { %v337_v3 = vmul.f32 %v336_v23, %v334_v1 }
 0x1df   :  { %v338_v4 = vxor.u32 2147483648, %v337_v3 }
 0x1e1   :  { %v339_v6 = vsel %vm256_vm5, %v338_v4, %v337_v3 }
 0x1e2   :  { %v342_v7 = vsel %vm255_vm6, %v601_v60, %v339_v6 }
 0x1e3   :  { %463 = vcosq.f32 %v342_v7 }
 0x1e4   :  { %465 = vsinq.f32 %v342_v7 }
 0x1f0   :  { %v464_v12 = vpop.eup %463 }
 0x1f1   :  { %v466_v13 = vpop.eup %465  ;;  %v354_v14 = vxor.u32 2147483648, %v464_v12 }
 0x1f2   :  { %v351_v15 = vxor.u32 2147483648, %v466_v13 }
 0x1f3   :  { %v355_v16 = vsel %vm353_vm7, %v354_v14, %v466_v13 }
 0x1f4   :  { %v352_v17 = vsel %vm350_vm8, %v464_v12, %v351_v15 }
 0x1f5   :  { %v356_v2 = vsel %vm349_vm9, %v352_v17, %v355_v16 }
 0x1f6   :  { %v357_v18 = vsel %vm346_vm10, nan, %v356_v2 }
 0x1f7   :  { %358 = vst [vmem:[#allocation5] sm:$0xff] %v357_v18 }
 0x1f8   :  { %498 = shalt.err (!%p495_p9)
}
 0x1f9   :  { %368 = dma.vmem_to_hbm [thread:$0]  %s366_s29, 128, %s641_s5, [#allocation4]  }
 0x1fa   :  { %509 = dma.done.wait [#allocation4], 128  }
 0x1fb   :  { %510 = vsyncadd [#allocation4], 4294967168 }
 0x1fc   :  { %372 = vsyncpa [#allocation3], 1 }
 0x1fd   :  { %373 = vsyncpa [#allocation4], 1 }

// kernel: tpu_custom_call.1
= control target key start
LH: loop header
LB: loop body
LE: loop exit
PB: predicated region body
PF: predicated region fallthrough
CT: control target
= control target key end

     0   :  { %10 = vsyncpa [#allocation3], 0  ;;  %s636_s0 = inlined_call_operand.vmem [shape: f32[8,1], index: 0, kind: input, shape index: {}]   ;;  %s637_s1 = inlined_call_operand.vmem [shape: f32[1,128], index: 1, kind: input, shape index: {}]   ;;  %s638_s2 = inlined_call_operand.vmem [shape: f32[1,128], index: 2, kind: input, shape index: {}]   ;;  %s639_s3 = inlined_call_operand.hbm [shape: f32[1,128,128], index: 3, kind: input, shape index: {}]   ;;  %s640_s4 = inlined_call_operand.vmem [shape: f32[1,1,128], index: 4, kind: input, shape index: {}]   ;;  %s641_s5 = inlined_call_operand.hbm [shape: f32[8,128], index: 5, kind: output, shape index: {}]  }
   0x1   :  { %11 = vsyncpa [#allocation4], 0  ;;  %s511_s18 = smov [#allocation2]  }
   0x2   :  { %s23_s19 = sshll.u32 %s511_s18, 4  ;;  %s24_s19 = int_to_ptr.vmem [resolvable:$true] %s23_s19 }
   0x3   :  { %s475_s20 = scalar_lea.vmem %s24_s19, 2048  ;;  %p480_p1 = scmp.lt.s32.totalorder %s24_s19, %s24_s19 }
   0x4   :  { %p476_p0 = scmp.ne.s32.totalorder %s24_s19, %s475_s20  ;;  %p481_p2 = scmp.lt.s32.totalorder %s475_s20, %s475_s20 }
   0x6   :  { %p482_p3 = por %p481_p2, %p480_p1 }
   0x8   :  { %p483_p4 = pnand %p482_p3, %p476_p0 }
   0xa   :  { %486 = shalt.err (!%p483_p4)
}
   0xb   :  { %s512_s21 = smov 128   ;;  %s513_s22 = smov 8  }
   0xc   :  { %29 = dma.hbm_to_vmem [thread:$0]  %s639_s3, 2048, %s24_s19, [#allocation3], %s512_s21, %s512_s21, %s513_s22  }
   0xd   :  { %507 = dma.done.wait [#allocation3], 2048  }
   0xe   :  { %508 = vsyncadd [#allocation3], 4294965248  ;;  %v514_v0 = vmov 0   ;;  %v35_v1 = vld [vmem:[%s636_s0] sm:$0xff]  ;;  %v176_v2 = vld [vmem:[#allocation2 + $0x78] sm:$0xff]  ;;  %v515_v3 = vmov 0.0  }
   0xf   :  { %458 = vset.pattern.permute.xlu0 %v514_v0  ;;  %402 = vmatprep.subr.mxu0 %v515_v3  ;;  %v175_v4 = vld [vmem:[#allocation2 + $0x70] sm:$0xff]  ;;  %vm516_vm0 = vmmov 0   ;;  %v174_v5 = vld [vmem:[#allocation2 + $0x68] sm:$0xff]  ;;  %v173_v6 = vld [vmem:[#allocation2 + $0x60] sm:$0xff]  ;;  %v517_v35 = vmov 2102212464  }
  0x10   :  { %39 = vperm.xlu0 %458, %v35_v1   ;;  %434 = vmatprep.mubr.msk.f32.mxu0 %vm516_vm0, %v515_v3  ;;  %v172_v7 = vld [vmem:[#allocation2 + $0x58] sm:$0xff]  ;;  %v171_v8 = vld [vmem:[#allocation2 + $0x50] sm:$0xff]  ;;  %v170_v9 = vld [vmem:[#allocation2 + $0x48] sm:$0xff]  ;;  %v518_v37 = vmov 920167782  }
  0x11   :  { %403 = vmatpush3.msra.mxu0 %v176_v2  ;;  %v169_v10 = vld [vmem:[#allocation2 + $0x40] sm:$0xff]  ;;  %v168_v11 = vld [vmem:[#allocation2 + $0x38] sm:$0xff]  ;;  %v167_v12 = vld [vmem:[#allocation2 + $0x30] sm:$0xff]  ;;  %v519_v41 = vmov 1326507024  }
  0x12   :  { %404 = vmatprep.subr.mxu0 %v515_v3  ;;  %v166_v13 = vld [vmem:[#allocation2 + $0x28] sm:$0xff]  ;;  %v165_v14 = vld [vmem:[#allocation2 + $0x20] sm:$0xff]  ;;  %v164_v15 = vld [vmem:[#allocation2 + $0x18] sm:$0xff]  ;;  %v520_v43 = vmov 683565275  }
  0x13   :  { %405 = vmatpush3.msra.mxu0 %v175_v4  ;;  %v163_v16 = vld [vmem:[#allocation2 + $0x10] sm:$0xff]  ;;  %v162_v17 = vld [vmem:[#allocation2 + $0x8] sm:$0xff]  ;;  %v161_v18 = vld [vmem:[#allocation2] sm:$0xff]  ;;  %v521_v45 = vmov 2475754826  }
  0x14   :  { %406 = vmatprep.subr.mxu0 %v515_v3  ;;  %v374_v19 = vld [vmem:[%s637_s1] ss:$0 sm:$0xff]  ;;  %v522_v48 = vmov 2131351028  }
  0x15   :  { %407 = vmatpush3.msra.mxu0 %v174_v5  ;;  %v375_v20 = vld [vmem:[%s638_s2] ss:$0 sm:$0xff] }
  0x16   :  { %408 = vmatprep.subr.mxu0 %v515_v3 }
  0x17   :  { %409 = vmatpush3.msra.mxu0 %v173_v6 }
  0x18   :  { %410 = vmatprep.subr.mxu0 %v515_v3 }
  0x19   :  { %411 = vmatpush3.msra.mxu0 %v172_v7 }
  0x1a   :  { %412 = vmatprep.subr.mxu0 %v515_v3 }
  0x1b   :  { %413 = vmatpush3.msra.mxu0 %v171_v8 }
  0x1c   :  { %414 = vmatprep.subr.mxu0 %v515_v3 }
  0x1d   :  { %415 = vmatpush3.msra.mxu0 %v170_v9 }
  0x1e   :  { %416 = vmatprep.subr.mxu0 %v515_v3 }
  0x1f   :  { %417 = vmatpush3.msra.mxu0 %v169_v10 }
  0x20   :  { %418 = vmatprep.subr.mxu0 %v515_v3 }
  0x21   :  { %419 = vmatpush3.msra.mxu0 %v168_v11 }
  0x22   :  { %420 = vmatprep.subr.mxu0 %v515_v3 }
  0x23   :  { %421 = vmatpush3.msra.mxu0 %v167_v12 }
  0x24   :  { %422 = vmatprep.subr.mxu0 %v515_v3 }
  0x25   :  { %423 = vmatpush3.msra.mxu0 %v166_v13 }
  0x26   :  { %424 = vmatprep.subr.mxu0 %v515_v3 }
  0x27   :  { %425 = vmatpush3.msra.mxu0 %v165_v14 }
  0x28   :  { %426 = vmatprep.subr.mxu0 %v515_v3 }
  0x29   :  { %427 = vmatpush3.msra.mxu0 %v164_v15 }
  0x2a   :  { %428 = vmatprep.subr.mxu0 %v515_v3 }
  0x2b   :  { %429 = vmatpush3.msra.mxu0 %v163_v16 }
  0x2c   :  { %430 = vmatprep.subr.mxu0 %v515_v3 }
  0x2d   :  { %431 = vmatpush3.msra.mxu0 %v162_v17 }
  0x2e   :  { %432 = vmatprep.subr.mxu0 %v515_v3 }
  0x2f   :  { %433 = vmatpush3.msra.mxu0 %v161_v18 }
  0x8b   :  { %v40_v21 = vpop.permute.xlu0 %39 }
  0x8c   :  { %v48_v22 = vmul.f32 %v374_v19, %v40_v21 }
  0x8e   :  { %v566_v23 = vadd.f32 %v375_v20, %v48_v22 }
  0x90   :  { %v60_v24 = vand.u32 2139095040, %v566_v23  ;;  %v57_v25 = vand.u32 2147483647, %v566_v23  ;;  %vm59_vm8 = vcmp.lt.s32.totalorder %v566_v23, 0  ;;  %vm149_vm13 = vweird.f32 %v566_v23 }
  0x92   :  { %v61_v26 = vshrl.u32 %v60_v24, 23  ;;  %v64_v28 = vand.u32 8388607, %v57_v25  ;;  %vm58_vm9 = vcmp.le.f32.partialorder %v57_v25, 0.7853982 }
  0x94   :  { %v376_v27 = vadd.s32 4294967169, %v61_v26  ;;  %v65_v31 = vor.u32 8388608, %v64_v28 }
  0x96   :  { %v67_v29 = vadd.s32 1, %v376_v27  ;;  %v105_v39 = vshll.u32 %v65_v31, 8 }
  0x98   :  { %vm68_vm1 = vcmp.gt.s32.totalorder %v67_v29, 0 }
  0x99   :  { %v69_v30 = vsel %vm68_vm1, %v67_v29, 0 }
  0x9a   :  { %v71_v32 = vand.u32 31, %v69_v30  ;;  %v70_v33 = vshrl.u32 %v69_v30, 5 }
  0x9c   :  { %v72_v34 = vsub.s32 32, %v71_v32  ;;  %v83_v36 = vshll.u32 %v517_v35, %v71_v32  ;;  %v86_v38 = vshll.u32 %v518_v37, %v71_v32  ;;  %v74_v44 = vshll.u32 %v520_v43, %v71_v32 }
  0x9d   :  { %v77_v47 = vshll.u32 %v521_v45, %v71_v32  ;;  %v80_v50 = vshll.u32 %v522_v48, %v71_v32  ;;  %vm92_vm2 = vcmp.lt.s32.totalorder %v70_v33, 4  ;;  %vm89_vm3 = vcmp.lt.s32.totalorder %v70_v33, 1 }
  0x9e   :  { %v84_v40 = vshrl.u32 %v518_v37, %v72_v34  ;;  %v87_v42 = vshrl.u32 %v519_v41, %v72_v34  ;;  %v75_v46 = vshrl.u32 %v521_v45, %v72_v34  ;;  %v78_v49 = vshrl.u32 %v522_v48, %v72_v34 }
  0x9f   :  { %v81_v51 = vshrl.u32 %v517_v35, %v72_v34  ;;  %v73_v55 = vshrl.u32 %v520_v43, %v72_v34  ;;  %vm90_vm4 = vcmp.lt.s32.totalorder %v70_v33, 2  ;;  %vm91_vm5 = vcmp.lt.s32.totalorder %v70_v33, 3 }
  0xa0   :  { %v85_v52 = vor.u32 %v84_v40, %v83_v36  ;;  %v88_v53 = vor.u32 %v87_v42, %v86_v38  ;;  %v76_v54 = vor.u32 %v75_v46, %v74_v44  ;;  %v79_v56 = vor.u32 %v78_v49, %v77_v47 }
  0xa1   :  { %v82_v57 = vor.u32 %v81_v51, %v80_v50 }
  0xa2   :  { %v98_v58 = vsel %vm92_vm2, %v85_v52, 920167782  ;;  %v102_v59 = vsel %vm92_vm2, %v88_v53, 1326507024  ;;  %v97_v61 = vsel %vm89_vm3, %v76_v54, %v79_v56  ;;  %v93_v0 = vsel %vm89_vm3, %v73_v55, %v76_v54 }
  0xa3   :  { %v94_v60 = vsel %vm92_vm2, %v82_v57, 2102212464  ;;  %v99_v62 = vsel %vm91_vm5, %v82_v57, %v98_v58  ;;  %v101_v63 = vsel %vm89_vm3, %v79_v56, %v82_v57  ;;  %v103_v3 = vsel %vm91_vm5, %v85_v52, %v102_v59  ;;  %v380_v58 = vld [vmem:[%s640_s4] ss:$0 sm:$0xff]  ;;  %s523_s4 = smov [#allocation5]  }
  0xa4   :  { %v95_v1 = vsel %vm91_vm5, %v79_v56, %v94_v60  ;;  %v100_v2 = vsel %vm90_vm4, %v97_v61, %v99_v62  ;;  %v104_v4 = vsel %vm90_vm4, %v101_v63, %v103_v3  ;;  %s365_s29 = sshll.u32 %s523_s4, 4  ;;  %s366_s29 = int_to_ptr.vmem [resolvable:$true] %s365_s29 }
  0xa5   :  { %v583_v5 = vmul.u32.u64.low %v105_v39, %v100_v2  ;;  %v584_v6 = vmul.u32.u64.high %v105_v39, %v100_v2, %v583_v5  ;;  %v586_v7 = vmul.u32.u64.low %v105_v39, %v104_v4  ;;  %v587_v8 = vmul.u32.u64.high %v105_v39, %v104_v4, %v586_v7  ;;  %s487_s30 = scalar_lea.vmem %s366_s29, 128  ;;  %p492_p6 = scmp.lt.s32.totalorder %s366_s29, %s366_s29 }
  0xa6   :  { %v96_v9 = vsel %vm90_vm4, %v93_v0, %v95_v1  ;;  %p488_p5 = scmp.ne.s32.totalorder %s366_s29, %s487_s30  ;;  %p493_p7 = scmp.lt.s32.totalorder %s487_s30, %s487_s30 }
  0xa7   :  { %v115_v10 = vadd.s32 1, %v584_v6  ;;  %v112_v11 = vmul.u32 %v105_v39, %v96_v9  ;;  %vm114_vm6 = vc.u32 %v587_v8, %v583_v5  ;;  %v113_v24 = vadd.s32 %v583_v5, %v587_v8 }
  0xa8   :  { %p494_p8 = por %p493_p7, %p492_p6 }
  0xa9   :  { %v116_v12 = vsel %vm114_vm6, %v115_v10, %v584_v6 }
  0xaa   :  { %v117_v13 = vadd.s32 %v116_v12, %v112_v11  ;;  %p495_p9 = pnand %p494_p8, %p488_p5 }
  0xac   :  { %v118_v14 = vadd.s32 536870912, %v117_v13 }
  0xae   :  { %v119_v15 = vshrl.u32 %v118_v14, 30 }
  0xb0   :  { %v120_v16 = vshll.u32 %v119_v15, 30  ;;  %v143_v40 = vsub.s32 4, %v119_v15 }
  0xb2   :  { %v121_v17 = vsub.s32 %v117_v13, %v120_v16  ;;  %v144_v46 = vsel %vm59_vm8, %v143_v40, %v119_v15 }
  0xb3   :  { %v146_v47 = vsel %vm58_vm9, 0, %v144_v46 }
  0xb4   :  { %v123_v18 = vsub.s32 0, %v121_v17  ;;  %v150_v49 = vadd.s32 3, %v146_v47 }
  0xb6   :  { %v377_v19 = vmin.u32 %v123_v18, %v121_v17  ;;  %v151_v50 = vand.u32 3, %v150_v49 }
  0xb8   :  { %v125_v20 = vclz %v377_v19  ;;  %vm156_vm10 = vcmp.eq.s32.totalorder %v151_v50, 2  ;;  %vm153_vm11 = vcmp.eq.s32.totalorder %v151_v50, 0  ;;  %vm152_vm12 = vcmp.lt.s32.totalorder %v151_v50, 2 }
  0xba   :  { %v378_v21 = vadd.s32 4294967294, %v125_v20 }
  0xbc   :  { %vm379_vm7 = vcmp.lt.s32.totalorder %v378_v21, 0 }
  0xbd   :  { %v128_v22 = vsel %vm379_vm7, 0, %v378_v21 }
  0xbe   :  { %v129_v26 = vsub.s32 32, %v128_v22  ;;  %v133_v27 = vsub.s32 4294967266, %v128_v22  ;;  %v130_v28 = vshll.u32 %v121_v17, %v128_v22 }
  0xc0   :  { %v131_v29 = vshrl.u32 %v113_v24, %v129_v26  ;;  %v134_v30 = vadd.s32 127, %v133_v27 }
  0xc2   :  { %v132_v31 = vor.u32 %v131_v29, %v130_v28  ;;  %v135_v32 = vshll.u32 %v134_v30, 23 }
  0xc4   :  { %v136_v33 = vor.u32 4788187, %v135_v32  ;;  %v139_v36 = vcvt.s32.f32 %v132_v31 }
  0xc6   :  { %v137_v34 = vand.u32 2147483647, %v136_v33 }
  0xc8   :  { %v140_v38 = vmul.f32 %v139_v36, %v137_v34 }
  0xca   :  { %v141_v39 = vxor.u32 2147483648, %v140_v38 }
  0xcc   :  { %v142_v42 = vsel %vm59_vm8, %v141_v39, %v140_v38 }
  0xcd   :  { %v145_v44 = vsel %vm58_vm9, %v566_v23, %v142_v42 }
  0xce   :  { %459 = vcosq.f32 %v145_v44 }
  0xcf   :  { %461 = vsinq.f32 %v145_v44 }
  0xdb   :  { %v460_v51 = vpop.eup %459 }
  0xdc   :  { %v462_v52 = vpop.eup %461  ;;  %v157_v53 = vxor.u32 2147483648, %v460_v51 }
  0xdd   :  { %v154_v54 = vxor.u32 2147483648, %v462_v52 }
  0xde   :  { %v158_v55 = vsel %vm156_vm10, %v157_v53, %v462_v52 }
  0xdf   :  { %v155_v56 = vsel %vm153_vm11, %v460_v51, %v154_v54 }
  0xe0   :  { %v159_v25 = vsel %vm152_vm12, %v155_v56, %v158_v55 }
  0xe1   :  { %v160_v57 = vsel %vm149_vm13, nan, %v159_v25 }
  0xe2   :  { %435 = vmatmul.mubr.f32.vlgmr.msra.gmra.mxu0 %v160_v57 }
 0x1a2   :  { %v250_v59 = vpop.f32.mrf.mxu0 }
 0x1a3   :  { %v601_v60 = vadd.f32 %v380_v58, %v250_v59 }
 0x1a4   :  { %v436_v61 = vpop.f32.mrf.mxu0 }
 0x1a5   :  { %v257_v62 = vand.u32 2139095040, %v601_v60  ;;  %v254_v2 = vand.u32 2147483647, %v601_v60  ;;  %vm256_vm5 = vcmp.lt.s32.totalorder %v601_v60, 0  ;;  %vm346_vm10 = vweird.f32 %v601_v60 }
 0x1a7   :  { %v258_v63 = vshrl.u32 %v257_v62, 23  ;;  %v261_v4 = vand.u32 8388607, %v254_v2  ;;  %vm255_vm6 = vcmp.le.f32.partialorder %v254_v2, 0.7853982 }
 0x1a9   :  { %v381_v0 = vadd.s32 4294967169, %v258_v63  ;;  %v262_v17 = vor.u32 8388608, %v261_v4 }
 0x1ab   :  { %v264_v1 = vadd.s32 1, %v381_v0 }
 0x1ad   :  { %vm265_vm14 = vcmp.gt.s32.totalorder %v264_v1, 0 }
 0x1ae   :  { %v266_v23 = vsel %vm265_vm14, %v264_v1, 0 }
 0x1af   :  { %v268_v3 = vand.u32 31, %v266_v23  ;;  %v267_v6 = vshrl.u32 %v266_v23, 5 }
 0x1b1   :  { %v269_v5 = vsub.s32 32, %v268_v3  ;;  %v271_v7 = vshll.u32 %v520_v43, %v268_v3  ;;  %v274_v8 = vshll.u32 %v521_v45, %v268_v3  ;;  %v277_v11 = vshll.u32 %v522_v48, %v268_v3 }
 0x1b2   :  { %v280_v13 = vshll.u32 %v517_v35, %v268_v3  ;;  %v283_v15 = vshll.u32 %v518_v37, %v268_v3  ;;  %vm286_vm15 = vcmp.lt.s32.totalorder %v267_v6, 1  ;;  %vm289_vm0 = vcmp.lt.s32.totalorder %v267_v6, 4 }
 0x1b3   :  { %v272_v9 = vshrl.u32 %v521_v45, %v269_v5  ;;  %v275_v10 = vshrl.u32 %v522_v48, %v269_v5  ;;  %v278_v12 = vshrl.u32 %v517_v35, %v269_v5  ;;  %v281_v14 = vshrl.u32 %v518_v37, %v269_v5 }
 0x1b4   :  { %v284_v16 = vshrl.u32 %v519_v41, %v269_v5  ;;  %v270_v26 = vshrl.u32 %v520_v43, %v269_v5  ;;  %vm288_vm1 = vcmp.lt.s32.totalorder %v267_v6, 3  ;;  %vm287_vm2 = vcmp.lt.s32.totalorder %v267_v6, 2 }
 0x1b5   :  { %v273_v18 = vor.u32 %v272_v9, %v271_v7  ;;  %v276_v19 = vor.u32 %v275_v10, %v274_v8  ;;  %v279_v20 = vor.u32 %v278_v12, %v277_v11  ;;  %v282_v21 = vor.u32 %v281_v14, %v280_v13 }
 0x1b6   :  { %v285_v45 = vor.u32 %v284_v16, %v283_v15  ;;  %v302_v41 = vshll.u32 %v262_v17, 8 }
 0x1b7   :  { %v291_v22 = vsel %vm289_vm0, %v279_v20, 2102212464  ;;  %v294_v48 = vsel %vm286_vm15, %v273_v18, %v276_v19  ;;  %v298_v24 = vsel %vm286_vm15, %v276_v19, %v279_v20  ;;  %v295_v35 = vsel %vm289_vm0, %v282_v21, 920167782 }
 0x1b8   :  { %v299_v27 = vsel %vm289_vm0, %v285_v45, 1326507024  ;;  %v296_v37 = vsel %vm288_vm1, %v279_v20, %v295_v35  ;;  %v290_v29 = vsel %vm286_vm15, %v270_v26, %v273_v18  ;;  %v292_v30 = vsel %vm288_vm1, %v276_v19, %v291_v22 }
 0x1b9   :  { %v300_v28 = vsel %vm288_vm1, %v282_v21, %v299_v27  ;;  %v297_v31 = vsel %vm287_vm2, %v294_v48, %v296_v37  ;;  %v293_v39 = vsel %vm287_vm2, %v290_v29, %v292_v30 }
 0x1ba   :  { %v301_v32 = vsel %vm287_vm2, %v298_v24, %v300_v28  ;;  %v621_v36 = vmul.u32.u64.low %v302_v41, %v297_v31  ;;  %v622_v38 = vmul.u32.u64.high %v302_v41, %v297_v31, %v621_v36  ;;  %v309_v40 = vmul.u32 %v302_v41, %v293_v39 }
 0x1bb   :  { %v618_v33 = vmul.u32.u64.low %v302_v41, %v301_v32  ;;  %v619_v34 = vmul.u32.u64.high %v302_v41, %v301_v32, %v618_v33 }
 0x1bc   :  { %v312_v43 = vadd.s32 1, %v622_v38 }
 0x1bd   :  { %vm311_vm3 = vc.u32 %v619_v34, %v621_v36  ;;  %v310_v56 = vadd.s32 %v621_v36, %v619_v34 }
 0x1be   :  { %v313_v42 = vsel %vm311_vm3, %v312_v43, %v622_v38 }
 0x1bf   :  { %v314_v44 = vadd.s32 %v313_v42, %v309_v40 }
 0x1c1   :  { %v315_v46 = vadd.s32 536870912, %v314_v44 }
 0x1c3   :  { %v316_v47 = vshrl.u32 %v315_v46, 30 }
 0x1c5   :  { %v317_v49 = vshll.u32 %v316_v47, 30  ;;  %v340_v5 = vsub.s32 4, %v316_v47 }
 0x1c7   :  { %v318_v50 = vsub.s32 %v314_v44, %v317_v49  ;;  %v341_v8 = vsel %vm256_vm5, %v340_v5, %v316_v47 }
 0x1c8   :  { %v343_v9 = vsel %vm255_vm6, 0, %v341_v8 }
 0x1c9   :  { %v320_v51 = vsub.s32 0, %v318_v50  ;;  %v347_v10 = vadd.s32 3, %v343_v9 }
 0x1cb   :  { %v382_v52 = vmin.u32 %v320_v51, %v318_v50  ;;  %v348_v11 = vand.u32 3, %v347_v10 }
 0x1cd   :  { %v322_v53 = vclz %v382_v52  ;;  %vm353_vm7 = vcmp.eq.s32.totalorder %v348_v11, 2  ;;  %vm350_vm8 = vcmp.eq.s32.totalorder %v348_v11, 0  ;;  %vm349_vm9 = vcmp.lt.s32.totalorder %v348_v11, 2 }
 0x1cf   :  { %v383_v54 = vadd.s32 4294967294, %v322_v53 }
 0x1d1   :  { %vm384_vm4 = vcmp.lt.s32.totalorder %v383_v54, 0 }
 0x1d2   :  { %v325_v55 = vsel %vm384_vm4, 0, %v383_v54 }
 0x1d3   :  { %v326_v25 = vsub.s32 32, %v325_v55  ;;  %v330_v57 = vsub.s32 4294967266, %v325_v55  ;;  %v327_v58 = vshll.u32 %v318_v50, %v325_v55 }
 0x1d5   :  { %v328_v59 = vshrl.u32 %v310_v56, %v326_v25  ;;  %v331_v61 = vadd.s32 127, %v330_v57 }
 0x1d7   :  { %v329_v62 = vor.u32 %v328_v59, %v327_v58  ;;  %v332_v63 = vshll.u32 %v331_v61, 23 }
 0x1d9   :  { %v333_v0 = vor.u32 4788187, %v332_v63  ;;  %v336_v23 = vcvt.s32.f32 %v329_v62 }
 0x1db   :  { %v334_v1 = vand.u32 2147483647, %v333_v0 }
 0x1dd   :  { %v337_v3 = vmul.f32 %v336_v23, %v334_v1 }
 0x1df   :  { %v338_v4 = vxor.u32 2147483648, %v337_v3 }
 0x1e1   :  { %v339_v6 = vsel %vm256_vm5, %v338_v4, %v337_v3 }
 0x1e2   :  { %v342_v7 = vsel %vm255_vm6, %v601_v60, %v339_v6 }
 0x1e3   :  { %463 = vcosq.f32 %v342_v7 }
 0x1e4   :  { %465 = vsinq.f32 %v342_v7 }
 0x1f0   :  { %v464_v12 = vpop.eup %463 }
 0x1f1   :  { %v466_v13 = vpop.eup %465  ;;  %v354_v14 = vxor.u32 2147483648, %v464_v12 }
 0x1f2   :  { %v351_v15 = vxor.u32 2147483648, %v466_v13 }
 0x1f3   :  { %v355_v16 = vsel %vm353_vm7, %v354_v14, %v466_v13 }
 0x1f4   :  { %v352_v17 = vsel %vm350_vm8, %v464_v12, %v351_v15 }
 0x1f5   :  { %v356_v2 = vsel %vm349_vm9, %v352_v17, %v355_v16 }
 0x1f6   :  { %v357_v18 = vsel %vm346_vm10, nan, %v356_v2 }
 0x1f7   :  { %358 = vst [vmem:[#allocation5] sm:$0xff] %v357_v18 }
 0x1f8   :  { %498 = shalt.err (!%p495_p9)
}
 0x1f9   :  { %368 = dma.vmem_to_hbm [thread:$0]  %s366_s29, 128, %s641_s5, [#allocation4]  }
 0x1fa   :  { %509 = dma.done.wait [#allocation4], 128  }
 0x1fb   :  { %510 = vsyncadd [#allocation4], 4294967168 }
 0x1fc   :  { %372 = vsyncpa [#allocation3], 1 }
 0x1fd   :  { %373 = vsyncpa [#allocation4], 1 }

</bundles_post_ra>
